<compile_context>
chip_gen: v7x
topology: tpu7x:2x2x1
jax: 0.10.0
libtpu: 0.0.40
codegen_flags: <defaults>
</compile_context>

<pallas_src>
import functools

import jax
import jax.numpy as jnp
from jax.experimental import pallas as pl
from jax.experimental.pallas import tpu as pltpu

KW = 4        # kernel size
PADW = 2      # ceil((4-1)/2)
NEG_SLOPE = 0.2
BN_EPS = 1e-5

# Tile ceilings (shrunk automatically for small problems).
TM, TN, TK = 256, 256, 256


def _round_up(v, m):
    return ((v + m - 1) // m) * m


# ---------------------------------------------------------------------------
# Pallas kernels
# ---------------------------------------------------------------------------
def _conv_kernel(x_ref, w_ref, b_ref, y_ref, stats_ref, acc_ref, *,
                 m_total, tm, apply_act):
    """Tiled (tm,tk)@(tk,tn) MXU matmul with f32 accumulator.

    Epilogue (at last K step): bias add, optional fused LeakyReLU, and fused
    per-tile BatchNorm partial statistics (row-masked sum / sum-of-squares).
    """
    mi = pl.program_id(0)
    ki = pl.program_id(2)

    @pl.when(ki == 0)
    def _():
        acc_ref[...] = jnp.zeros_like(acc_ref)

    acc_ref[...] += jnp.dot(x_ref[...], w_ref[...],
                            preferred_element_type=jnp.float32)

    @pl.when(ki == pl.num_programs(2) - 1)
    def _():
        y = acc_ref[...] + b_ref[...]
        if apply_act:
            y = jnp.where(y >= 0.0, y, NEG_SLOPE * y)
        y_ref[...] = y.astype(y_ref.dtype)

        # Partial BN stats in f32 (padded / out-of-range rows masked out).
        rows = jax.lax.broadcasted_iota(jnp.int32, y.shape, 0) + mi * tm
        mask = (rows < m_total).astype(jnp.float32)
        ym = y * mask
        s1 = jnp.sum(ym, axis=0, keepdims=True)          # (1, tn)
        s2 = jnp.sum(ym * ym, axis=0, keepdims=True)     # (1, tn)
        stats_ref[...] = jnp.concatenate([s1, s2], axis=0)[None, :, :]


def _affine_lrelu_kernel(y_ref, scale_ref, shift_ref, o_ref):
    # y * scale + shift followed by LeakyReLU (per-channel scale/shift encode
    # the BatchNorm normalization + affine).
    out = y_ref[...] * scale_ref[...] + shift_ref[...]
    out = jnp.where(out >= 0.0, out, NEG_SLOPE * out)
    o_ref[...] = out.astype(o_ref.dtype)


# ---------------------------------------------------------------------------
# Kernel wrappers
# ---------------------------------------------------------------------------
def conv_layer(patches, w_mat, bias, *, apply_act):
    """Conv as matmul: (M,K) @ (K,Cout) with tiled/pipelined Pallas kernel.

    Returns padded output (Mp, Cp) in f32, fused BN partial stats, and metadata.
    """
    M, K = patches.shape
    _, Cout = w_mat.shape

    tm = min(TM, _round_up(M, 8))
    tn = min(TN, _round_up(Cout, 128))
    tk = min(TK, _round_up(K, 128))
    Mp = _round_up(M, tm)
    Cp = _round_up(Cout, tn)
    Kp = _round_up(K, tk)

    # bf16 MXU operands (zero padded to tile multiples); bias stays f32.
    x = jnp.pad(patches, ((0, Mp - M), (0, Kp - K))).astype(jnp.bfloat16)
    w = jnp.pad(w_mat, ((0, Kp - K), (0, Cp - Cout))).astype(jnp.bfloat16)
    b = jnp.pad(bias.reshape(1, Cout).astype(jnp.float32),
                ((0, 0), (0, Cp - Cout)))

    gm, gn, gk = Mp // tm, Cp // tn, Kp // tk
    kernel = functools.partial(_conv_kernel, m_total=M, tm=tm,
                               apply_act=apply_act)

    y_pad, stats = pl.pallas_call(
        kernel,
        out_shape=(jax.ShapeDtypeStruct((Mp, Cp), jnp.float32),
                   jax.ShapeDtypeStruct((gm, 2, Cp), jnp.float32)),
        grid=(gm, gn, gk),
        in_specs=[pl.BlockSpec((tm, tk), lambda mi, ni, ki: (mi, ki)),
                  pl.BlockSpec((tk, tn), lambda mi, ni, ki: (ki, ni)),
                  pl.BlockSpec((1, tn), lambda mi, ni, ki: (0, ni))],
        out_specs=[pl.BlockSpec((tm, tn), lambda mi, ni, ki: (mi, ni)),
                   pl.BlockSpec((1, 2, tn), lambda mi, ni, ki: (mi, 0, ni))],
        scratch_shapes=[pltpu.VMEM((tm, tn), jnp.float32)],
        compiler_params=pltpu.CompilerParams(
            dimension_semantics=("parallel", "parallel", "arbitrary")),
    )(x, w, b)

    meta = (M, Cout, Mp, Cp, tm, tn)
    return y_pad, stats, meta


def bn_lrelu_apply(y_pad, stats, gamma, beta, meta):
    """Training-mode BatchNorm2d (batch stats over N*H*W) + LeakyReLU, tiled."""
    M, Cout, Mp, Cp, tm, tn = meta

    # Combine the per-M-tile partial stats (tiny: (gm, 2, Cp)) in f32.
    sums = jnp.sum(stats[:, 0, :], axis=0)
    sumsq = jnp.sum(stats[:, 1, :], axis=0)
    mean = sums / M
    var = jnp.maximum(sumsq / M - mean * mean, 0.0)   # biased var, like PyTorch
    inv = jax.lax.rsqrt(var + BN_EPS)

    gamma_p = jnp.pad(gamma, (0, Cp - Cout), constant_values=1.0)
    beta_p = jnp.pad(beta, (0, Cp - Cout))
    scale = (gamma_p * inv).reshape(1, Cp).astype(jnp.float32)
    shift = (beta_p - mean * gamma_p * inv).reshape(1, Cp).astype(jnp.float32)

    return pl.pallas_call(
        _affine_lrelu_kernel,
        out_shape=jax.ShapeDtypeStruct((Mp, Cp), jnp.float32),
        grid=(Mp // tm, Cp // tn),
        in_specs=[pl.BlockSpec((tm, tn), lambda mi, ni: (mi, ni)),
                  pl.BlockSpec((1, tn), lambda mi, ni: (0, ni)),
                  pl.BlockSpec((1, tn), lambda mi, ni: (0, ni))],
        out_specs=pl.BlockSpec((tm, tn), lambda mi, ni: (mi, ni)),
        compiler_params=pltpu.CompilerParams(
            dimension_semantics=("parallel", "parallel")),
    )(y_pad, scale, shift)


# ---------------------------------------------------------------------------
# Glue: im2col, parameter setup, forward
# ---------------------------------------------------------------------------
def im2col(x_nhwc, k, stride, pad):
    # TODO(synk): im2col still materializes the 16x-duplicated patch matrix in HBM;
    # a shifted-tap in-kernel formulation (reading the padded NHWC input directly)
    # would remove that traffic but needs strided/overlapping BlockSpecs.
    N, H, W, C = x_nhwc.shape
    xp = jnp.pad(x_nhwc, ((0, 0), (pad, pad), (pad, pad), (0, 0)))
    OH = (H + 2 * pad - k) // stride + 1
    OW = (W + 2 * pad - k) // stride + 1
    cols = []
    for di in range(k):
        for dj in range(k):
            cols.append(xp[:, di:di + stride * (OH - 1) + 1:stride,
                            dj:dj + stride * (OW - 1) + 1:stride, :])
    pat = jnp.stack(cols, axis=3)                       # (N, OH, OW, k*k, C)
    return pat.reshape(N * OH * OW, k * k * C), OH, OW


def init_params(key, in_channels, ndf=64, n_layers=3):
    # (cin, cout, stride, use_bn, use_act) per conv layer, as in the PyTorch __init__.
    cfgs = [(in_channels, ndf, 2, False, True)]
    nf_mult = 1
    for n in range(1, n_layers):
        nf_prev, nf_mult = nf_mult, min(2 ** n, 8)
        cfgs.append((ndf * nf_prev, ndf * nf_mult, 2, True, True))
    nf_prev, nf_mult = nf_mult, min(2 ** n_layers, 8)
    cfgs.append((ndf * nf_prev, ndf * nf_mult, 1, True, True))
    cfgs.append((ndf * nf_mult, 1, 1, False, False))

    params = []
    for cin, cout, stride, use_bn, use_act in cfgs:
        key, kw_, kb_ = jax.random.split(key, 3)
        bound = 1.0 / jnp.sqrt(cin * KW * KW)           # ~PyTorch default conv init range
        w = jax.random.uniform(kw_, (cout, cin, KW, KW), jnp.float32, -bound, bound)
        b = jax.random.uniform(kb_, (cout,), jnp.float32, -bound, bound)
        p = {"w": w, "b": b}
        if use_bn:
            p["gamma"] = jnp.ones((cout,), jnp.float32)
            p["beta"] = jnp.zeros((cout,), jnp.float32)
        params.append((p, stride, use_bn, use_act))
    return params


def my_patch_discriminator(x_nchw, params):
    """Forward pass. x_nchw: (N, C, H, W) float32. Returns (N, 1, OH, OW)."""
    x = jnp.transpose(x_nchw, (0, 2, 3, 1))             # -> NHWC
    N = x.shape[0]
    for p, stride, use_bn, use_act in params:
        cout, cin = p["w"].shape[0], p["w"].shape[1]
        patches, OH, OW = im2col(x, KW, stride, PADW)
        # weight[o, c, di, dj] -> matrix[(di*KW+dj)*cin + c, o] to match patch order
        w_mat = jnp.transpose(p["w"], (2, 3, 1, 0)).reshape(KW * KW * cin, cout)
        y_pad, stats, meta = conv_layer(patches, w_mat, p["b"],
                                        apply_act=(use_act and not use_bn))
        if use_bn:
            y_pad = bn_lrelu_apply(y_pad, stats, p["gamma"], p["beta"], meta)
        M = meta[0]
        x = y_pad[:M, :cout].reshape(N, OH, OW, cout)
    # TODO(synk): BatchNorm running_mean/running_var buffer updates are a training-time
    # side effect (not part of the functional forward output) and are not reproduced.
    return jnp.transpose(x, (0, 3, 1, 2))               # -> NCHW


if __name__ == "__main__":
    key = jax.random.PRNGKey(0)
    k_in, k_par = jax.random.split(key)

    # Small shapes: batch=2, in_channels=4, spatial=16, ndf=8, n_layers=3.
    N, C, H, W = 2, 4, 16, 16
    x = jax.random.normal(k_in, (N, C, H, W), jnp.float32)
    params = init_params(k_par, in_channels=C, ndf=8, n_layers=3)

    out = my_patch_discriminator(x, params)
    out = jax.block_until_ready(out)

    # Expected PatchGAN output shape for 16x16 input: (2, 1, 5, 5)
    assert out.shape == (N, 1, 5, 5), out.shape
    assert jnp.all(jnp.isfinite(out))
    print("KERNEL_OK")
</pallas_src>

<mosaic_0001>
module attributes {stable_mosaic.version = 11 : i64} {
  func.func @_conv_kernel(%arg0: i32, %arg1: i32, %arg2: i32, %arg3: memref<168x128xbf16, #tpu.memory_space<vmem>>, %arg4: memref<128x128xbf16, #tpu.memory_space<vmem>>, %arg5: memref<1x128xf32, #tpu.memory_space<vmem>>, %arg6: memref<168x128xf32, #tpu.memory_space<vmem>>, %arg7: memref<1x2x128xf32, #tpu.memory_space<vmem>>, %arg8: memref<168x128xf32, #tpu.memory_space<vmem>>) attributes {dimension_semantics = [#tpu.dimension_semantics<parallel>, #tpu.dimension_semantics<parallel>, #tpu.dimension_semantics<arbitrary>], iteration_bounds = array<i64: 1, 1, 1>, scalar_prefetch = 0 : i64, scratch_operands = 1 : i64, tpu.core_type = #tpu.core_type<tc>, window_params = [{transform_indices = @transform_0, window_bounds = array<i64: 168, 128>}, {transform_indices = @transform_1, window_bounds = array<i64: 128, 128>}, {transform_indices = @transform_2, window_bounds = array<i64: 1, 128>}, {transform_indices = @transform_3, window_bounds = array<i64: 168, 128>}, {transform_indices = @transform_4, window_bounds = array<i64: 1, 2, 128>}]} {
    %c0_i32 = arith.constant 0 : i32
    %0 = arith.cmpi eq, %arg2, %c0_i32 : i32
    %1 = arith.extui %0 : i1 to i32
    %c0_i32_0 = arith.constant 0 : i32
    %2 = arith.cmpi ne, %1, %c0_i32_0 : i32
    scf.if %2 {
      %cst_10 = arith.constant 0.000000e+00 : f32
      %12 = vector.broadcast %cst_10 : f32 to vector<168x128xf32>
      %c0_11 = arith.constant 0 : index
      %c0_12 = arith.constant 0 : index
      %13 = vector.load %arg8[%c0_11, %c0_12] : memref<168x128xf32, #tpu.memory_space<vmem>>, vector<168x128xf32>
      tpu.vector_store %arg8[%c0_11, %c0_12], %12 {strides = array<i32>} : memref<168x128xf32, #tpu.memory_space<vmem>>, vector<168x128xf32>,
    } else {
    }
    %c0 = arith.constant 0 : index
    %c0_1 = arith.constant 0 : index
    %3 = vector.load %arg8[%c0, %c0_1] : memref<168x128xf32, #tpu.memory_space<vmem>>, vector<168x128xf32>
    %c0_2 = arith.constant 0 : index
    %c0_3 = arith.constant 0 : index
    %4 = vector.load %arg3[%c0_2, %c0_3] : memref<168x128xbf16, #tpu.memory_space<vmem>>, vector<168x128xbf16>
    %c0_4 = arith.constant 0 : index
    %c0_5 = arith.constant 0 : index
    %5 = vector.load %arg4[%c0_4, %c0_5] : memref<128x128xbf16, #tpu.memory_space<vmem>>, vector<128x128xbf16>
    %cst = arith.constant dense<0.000000e+00> : vector<168x128xf32>
    %6 = tpu.matmul %4, %5, %cst {dimension_numbers = #tpu.dot_dimension_numbers<[1], [0], [0], [1], [0, 0, 1, 1], [], []>} : vector<168x128xbf16>, vector<128x128xbf16>, vector<168x128xf32> -> vector<168x128xf32>
    %7 = arith.addf %3, %6 : vector<168x128xf32>
    %c0_6 = arith.constant 0 : index
    %c0_7 = arith.constant 0 : index
    %8 = vector.load %arg8[%c0_6, %c0_7] : memref<168x128xf32, #tpu.memory_space<vmem>>, vector<168x128xf32>
    tpu.vector_store %arg8[%c0_6, %c0_7], %7 {strides = array<i32>} : memref<168x128xf32, #tpu.memory_space<vmem>>, vector<168x128xf32>,
    %c0_i32_8 = arith.constant 0 : i32
    %9 = arith.cmpi eq, %arg2, %c0_i32_8 : i32
    %10 = arith.extui %9 : i1 to i32
    %c0_i32_9 = arith.constant 0 : i32
    %11 = arith.cmpi ne, %10, %c0_i32_9 : i32
    scf.if %11 {
      %c0_10 = arith.constant 0 : index
      %c0_11 = arith.constant 0 : index
      %12 = vector.load %arg8[%c0_10, %c0_11] : memref<168x128xf32, #tpu.memory_space<vmem>>, vector<168x128xf32>
      %c0_12 = arith.constant 0 : index
      %c0_13 = arith.constant 0 : index
      %13 = vector.load %arg5[%c0_12, %c0_13] : memref<1x128xf32, #tpu.memory_space<vmem>>, vector<1x128xf32>
      %14 = vector.broadcast %13 : vector<1x128xf32> to vector<168x128xf32>
      %15 = arith.addf %12, %14 : vector<168x128xf32>
      %cst_14 = arith.constant 0.000000e+00 : f32
      %16 = vector.broadcast %cst_14 : f32 to vector<168x128xf32>
      %17 = arith.cmpf oge, %15, %16 : vector<168x128xf32>
      %cst_15 = arith.constant 2.000000e-01 : f32
      %18 = vector.broadcast %cst_15 : f32 to vector<168x128xf32>
      %19 = arith.mulf %18, %15 : vector<168x128xf32>
      %20 = arith.select %17, %15, %19 : vector<168x128xi1>, vector<168x128xf32>
      %c0_16 = arith.constant 0 : index
      %c0_17 = arith.constant 0 : index
      %21 = vector.load %arg6[%c0_16, %c0_17] : memref<168x128xf32, #tpu.memory_space<vmem>>, vector<168x128xf32>
      tpu.vector_store %arg6[%c0_16, %c0_17], %20 {strides = array<i32>} : memref<168x128xf32, #tpu.memory_space<vmem>>, vector<168x128xf32>,
      %22 = tpu.iota {dimensions = array<i32: 0>} : vector<168x128xi32>
      %c168_i32 = arith.constant 168 : i32
      %23 = arith.muli %arg0, %c168_i32 : i32
      %24 = vector.broadcast %23 : i32 to vector<168x128xi32>
      %25 = arith.addi %22, %24 : vector<168x128xi32>
      %c162_i32 = arith.constant 162 : i32
      %26 = vector.broadcast %c162_i32 : i32 to vector<168x128xi32>
      %27 = arith.cmpi slt, %25, %26 : vector<168x128xi32>
      %28 = arith.extui %27 : vector<168x128xi1> to vector<168x128xi32>
      %29 = arith.sitofp %28 : vector<168x128xi32> to vector<168x128xf32>
      %30 = arith.mulf %20, %29 : vector<168x128xf32>
      %cst_18 = arith.constant dense<0.000000e+00> : vector<128xf32>
      %31 = vector.multi_reduction <add>, %30, %cst_18 [0] : vector<168x128xf32> to vector<128xf32>
      %32 = vector.shape_cast %31 : vector<128xf32> to vector<1x128xf32>
      %33 = arith.mulf %30, %30 : vector<168x128xf32>
      %cst_19 = arith.constant dense<0.000000e+00> : vector<128xf32>
      %34 = vector.multi_reduction <add>, %33, %cst_19 [0] : vector<168x128xf32> to vector<128xf32>
      %35 = vector.shape_cast %34 : vector<128xf32> to vector<1x128xf32>
      %36 = tpu.concatenate %32, %35 in 0 : vector<1x128xf32>, vector<1x128xf32> -> vector<2x128xf32>
      %37 = vector.shape_cast %36 : vector<2x128xf32> to vector<1x2x128xf32>
      %c0_20 = arith.constant 0 : index
      %c0_21 = arith.constant 0 : index
      %c0_22 = arith.constant 0 : index
      %38 = vector.load %arg7[%c0_20, %c0_21, %c0_22] : memref<1x2x128xf32, #tpu.memory_space<vmem>>, vector<1x2x128xf32>
      tpu.vector_store %arg7[%c0_20, %c0_21, %c0_22], %37 {strides = array<i32>} : memref<1x2x128xf32, #tpu.memory_space<vmem>>, vector<1x2x128xf32>,
    } else {
    }
    return
  }
  func.func @transform_0(%arg0: i32, %arg1: i32, %arg2: i32) -> (i32, i32) {
    %c0_i32 = arith.constant 0 : i32
    return %arg0, %arg2 : i32, i32
  }
  func.func @transform_1(%arg0: i32, %arg1: i32, %arg2: i32) -> (i32, i32) {
    %c0_i32 = arith.constant 0 : i32
    return %arg2, %arg1 : i32, i32
  }
  func.func @transform_2(%arg0: i32, %arg1: i32, %arg2: i32) -> (i32, i32) {
    %c0_i32 = arith.constant 0 : i32
    %c0_i32_0 = arith.constant 0 : i32
    return %c0_i32, %arg1 : i32, i32
  }
  func.func @transform_3(%arg0: i32, %arg1: i32, %arg2: i32) -> (i32, i32) {
    %c0_i32 = arith.constant 0 : i32
    return %arg0, %arg1 : i32, i32
  }
  func.func @transform_4(%arg0: i32, %arg1: i32, %arg2: i32) -> (i32, i32, i32) {
    %c0_i32 = arith.constant 0 : i32
    %c0_i32_0 = arith.constant 0 : i32
    return %arg0, %c0_i32, %arg1 : i32, i32, i32
  }
}

</mosaic_0001>

<bundles_post_ra>
// kernel: tpu_custom_call.1
= control target key start
LH: loop header
LB: loop body
LE: loop exit
PB: predicated region body
PF: predicated region fallthrough
CT: control target
= control target key end

     0   :  { %10 = vsyncpa [#allocation4], 0  ;;  %s1218_s0 = inlined_call_operand.hbm [shape: bf16[168,128], index: 0, kind: input, shape index: {}]   ;;  %s1219_s1 = inlined_call_operand.hbm [shape: bf16[128,128], index: 1, kind: input, shape index: {}]   ;;  %s1220_s2 = inlined_call_operand.vmem [shape: f32[1,128], index: 2, kind: input, shape index: {}]   ;;  %s1221_s3 = inlined_call_operand.hbm [shape: f32[168,128], index: 3, kind: output, shape index: {0}]   ;;  %s1222_s4 = inlined_call_operand.hbm [shape: f32[1,2,128], index: 4, kind: output, shape index: {1}]  }
   0x1   :  { %11 = vsyncpa [#allocation7], 0 }
   0x2   :  { %12 = vsyncpa [#allocation5], 0 }
   0x3   :  { %13 = vsyncpa [#allocation10], 0  ;;  %s1018_s15 = smov [#allocation3]   ;;  %s922_s19 = scalar_lea.hbm %s1218_s0, 1344 }
   0x4   :  { %s19_s16 = sshll.u32 %s1018_s15, 4  ;;  %p923_p0 = scmp.ne.s32.totalorder %s1218_s0, %s922_s19  ;;  %s20_s16 = int_to_ptr.vmem [resolvable:$true] %s19_s16 }
   0x5   :  { %p926_p1 = scmp.lt.u32.totalorder %s922_s19, %s1218_s0 }
   0x7   :  { %p928_p2 = pnand %p926_p1, %p923_p0 }
   0x9   :  { %931 = shalt.err (!%p928_p2)
}
   0xa   :  { %s932_s24 = scalar_lea.vmem %s20_s16, 1344  ;;  %p937_p4 = scmp.lt.s32.totalorder %s20_s16, %s20_s16 }
   0xb   :  { %p933_p3 = scmp.ne.s32.totalorder %s20_s16, %s932_s24  ;;  %p938_p5 = scmp.lt.s32.totalorder %s932_s24, %s932_s24 }
   0xd   :  { %p939_p6 = por %p938_p5, %p937_p4 }
   0xf   :  { %p940_p7 = pnand %p939_p6, %p933_p3 }
  0x11   :  { %943 = shalt.err (!%p940_p7)
}
  0x12   :  { %s1019_s25 = smov 64   ;;  %s1020_s26 = smov 4  }
  0x13   :  { %25 = dma.hbm_to_vmem [thread:$0]  %s1218_s0, 1344, %s20_s16, [#allocation4], %s1019_s25, %s1019_s25, %s1020_s26  }
  0x14   :  { %s1021_s29 = smov [#allocation6]   ;;  %s944_s7 = scalar_lea.hbm %s1219_s1, 1024 }
  0x15   :  { %s31_s30 = sshll.u32 %s1021_s29, 4  ;;  %p945_p8 = scmp.ne.s32.totalorder %s1219_s1, %s944_s7  ;;  %s32_s30 = int_to_ptr.vmem [resolvable:$true] %s31_s30 }
  0x16   :  { %p948_p9 = scmp.lt.u32.totalorder %s944_s7, %s1219_s1 }
  0x18   :  { %p950_p10 = pnand %p948_p9, %p945_p8 }
  0x1a   :  { %953 = shalt.err (!%p950_p10)
}
  0x1b   :  { %s954_s12 = scalar_lea.vmem %s32_s30, 1024  ;;  %p959_p12 = scmp.lt.s32.totalorder %s32_s30, %s32_s30 }
  0x1c   :  { %p955_p11 = scmp.ne.s32.totalorder %s32_s30, %s954_s12  ;;  %p960_p13 = scmp.lt.s32.totalorder %s954_s12, %s954_s12 }
  0x1e   :  { %p961_p0 = por %p960_p13, %p959_p12 }
  0x20   :  { %p962_p1 = pnand %p961_p0, %p955_p11 }
  0x22   :  { %965 = shalt.err (!%p962_p1)
}
  0x23   :  { %37 = dma.hbm_to_vmem [thread:$0]  %s1219_s1, 1024, %s32_s30, [#allocation7], %s1019_s25, %s1019_s25, %s1020_s26  }
  0x24   :  { %1010 = dma.done.wait [#allocation4], 1344  }
  0x25   :  { %1011 = vsyncadd [#allocation4], 4294965952 }
  0x26   :  { %1012 = dma.done.wait [#allocation7], 1024  }
  0x27   :  { %1013 = vsyncadd [#allocation7], 4294966272  ;;  %v1022_v0 = vmov 0.0   ;;  %vm1023_vm0 = vmmov 0   ;;  %v903_v1 = vld [vmem:[#allocation6] sm:$0xff]   ;;  %v904_v2 = vld [vmem:[#allocation6 + $0x8] sm:$0xff]  }
  0x28   :  { %817 = vmatprep.subr.bf16.mxu0 %v1022_v0  ;;  %877 = vmatprep.subr.bf16.mxu1 %v1022_v0  ;;  %v905_v3 = vld [vmem:[#allocation6 + $0x10] sm:$0xff]   ;;  %v906_v4 = vld [vmem:[#allocation6 + $0x18] sm:$0xff]   ;;  %v907_v5 = vld [vmem:[#allocation6 + $0x20] sm:$0xff]  }
  0x29   :  { %833 = vmatprep.mubr.msk.bf16.mxu0 %vm1023_vm0, %v1022_v0  ;;  %857 = vmatprep.mubr.msk.bf16.mxu1 %vm1023_vm0, %v1022_v0  ;;  %v908_v6 = vld [vmem:[#allocation6 + $0x28] sm:$0xff]   ;;  %v909_v7 = vld [vmem:[#allocation6 + $0x30] sm:$0xff]   ;;  %v910_v8 = vld [vmem:[#allocation6 + $0x38] sm:$0xff]  }
  0x2a   :  { %818 = vmatpush3.bf16.msra.mxu0 %v903_v1  ;;  %885 = vmatpush3.bf16.msra.mxu1 %v903_v1  ;;  %v911_v9 = vld [vmem:[#allocation3] sm:$0xff]   ;;  %v914_v10 = vld [vmem:[#allocation3 + $0x30] sm:$0xff]   ;;  %v912_v11 = vld [vmem:[#allocation3 + $0x8] sm:$0xff]  }
  0x2b   :  { %819 = vmatprep.subr.bf16.mxu0 %v1022_v0  ;;  %878 = vmatprep.subr.bf16.mxu1 %v1022_v0  ;;  %v916_v12 = vld [vmem:[#allocation3 + $0x38] sm:$0xff]   ;;  %v913_v13 = vld [vmem:[#allocation3 + $0x10] sm:$0xff]   ;;  %v918_v14 = vld [vmem:[#allocation3 + $0x40] sm:$0xff]  }
  0x2c   :  { %v915_v15 = vld [vmem:[#allocation3 + $0x18] sm:$0xff]   ;;  %v920_v16 = vld [vmem:[#allocation3 + $0x48] sm:$0xff]   ;;  %v917_v17 = vld [vmem:[#allocation3 + $0x20] sm:$0xff]  }
  0x2d   :  { %v921_v18 = vld [vmem:[#allocation3 + $0x50] ss:$0 sps:$4 sm:$0xff]   ;;  %v919_v19 = vld [vmem:[#allocation3 + $0x28] sm:$0xff]   ;;  %v1118_v20 = vld [vmem:[%s1220_s2] ss:$0 sm:$0xff]  ;;  %s1024_s2 = smov [#allocation8]  }
  0x2e   :  { %820 = vmatpush3.bf16.msra.mxu0 %v904_v2  ;;  %886 = vmatpush3.bf16.msra.mxu1 %v904_v2  ;;  %s750_s15 = sshll.u32 %s1024_s2, 4  ;;  %s751_s15 = int_to_ptr.vmem [resolvable:$true] %s750_s15 }
  0x2f   :  { %821 = vmatprep.subr.bf16.mxu0 %v1022_v0  ;;  %879 = vmatprep.subr.bf16.mxu1 %v1022_v0  ;;  %s966_s16 = scalar_lea.vmem %s751_s15, 2688  ;;  %p971_p3 = scmp.lt.s32.totalorder %s751_s15, %s751_s15 }
  0x30   :  { %p967_p2 = scmp.ne.s32.totalorder %s751_s15, %s966_s16  ;;  %p972_p4 = scmp.lt.s32.totalorder %s966_s16, %s966_s16 }
  0x32   :  { %822 = vmatpush3.bf16.msra.mxu0 %v905_v3  ;;  %887 = vmatpush3.bf16.msra.mxu1 %v905_v3  ;;  %p973_p5 = por %p972_p4, %p971_p3 }
  0x33   :  { %823 = vmatprep.subr.bf16.mxu0 %v1022_v0  ;;  %880 = vmatprep.subr.bf16.mxu1 %v1022_v0 }
  0x34   :  { %p974_p6 = pnand %p973_p5, %p967_p2 }
  0x36   :  { %824 = vmatpush3.bf16.msra.mxu0 %v906_v4  ;;  %888 = vmatpush3.bf16.msra.mxu1 %v906_v4 }
  0x37   :  { %825 = vmatprep.subr.bf16.mxu0 %v1022_v0  ;;  %881 = vmatprep.subr.bf16.mxu1 %v1022_v0 }
  0x3a   :  { %826 = vmatpush3.bf16.msra.mxu0 %v907_v5  ;;  %889 = vmatpush3.bf16.msra.mxu1 %v907_v5 }
  0x3b   :  { %827 = vmatprep.subr.bf16.mxu0 %v1022_v0  ;;  %882 = vmatprep.subr.bf16.mxu1 %v1022_v0 }
  0x3e   :  { %828 = vmatpush3.bf16.msra.mxu0 %v908_v6  ;;  %890 = vmatpush3.bf16.msra.mxu1 %v908_v6 }
  0x3f   :  { %829 = vmatprep.subr.bf16.mxu0 %v1022_v0  ;;  %883 = vmatprep.subr.bf16.mxu1 %v1022_v0 }
  0x42   :  { %830 = vmatpush3.bf16.msra.mxu0 %v909_v7  ;;  %891 = vmatpush3.bf16.msra.mxu1 %v909_v7 }
  0x43   :  { %831 = vmatprep.subr.bf16.mxu0 %v1022_v0  ;;  %884 = vmatprep.subr.bf16.mxu1 %v1022_v0 }
  0x46   :  { %832 = vmatpush3.bf16.msra.mxu0 %v910_v8  ;;  %892 = vmatpush3.bf16.msra.mxu1 %v910_v8 }
  0x49   :  { %834 = vmatmul.mubr.bf16.vlgmr.msra.gmra.mrb[0].mxu0 %v911_v9  ;;  %858 = vmatmul.mubr.bf16.vlgmr.msra.gmra.mrb[0].mxu1 %v914_v10 }
  0x4a   :  { %837 = vmatprep.mubr.msk.bf16.mxu0 %vm1023_vm0, %v1022_v0  ;;  %861 = vmatprep.mubr.msk.bf16.mxu1 %vm1023_vm0, %v1022_v0 }
  0x51   :  { %838 = vmatmul.mubr.bf16.gmra.mrb[4].mxu0 %v912_v11  ;;  %862 = vmatmul.mubr.bf16.gmra.mrb[4].mxu1 %v916_v12 }
  0x52   :  { %841 = vmatprep.mubr.msk.bf16.mxu0 %vm1023_vm0, %v1022_v0  ;;  %865 = vmatprep.mubr.msk.bf16.mxu1 %vm1023_vm0, %v1022_v0 }
  0x59   :  { %842 = vmatmul.mubr.bf16.gmra.mrb[8].mxu0 %v913_v13  ;;  %866 = vmatmul.mubr.bf16.gmra.mrb[8].mxu1 %v918_v14 }
  0x5a   :  { %845 = vmatprep.mubr.msk.bf16.mxu0 %vm1023_vm0, %v1022_v0  ;;  %869 = vmatprep.mubr.msk.bf16.mxu1 %vm1023_vm0, %v1022_v0 }
  0x61   :  { %846 = vmatmul.mubr.bf16.gmra.mrb[12].mxu0 %v915_v15  ;;  %870 = vmatmul.mubr.bf16.gmra.mrb[12].mxu1 %v920_v16 }
  0x62   :  { %849 = vmatprep.mubr.msk.bf16.mxu0 %vm1023_vm0, %v1022_v0  ;;  %873 = vmatprep.mubr.msk.bf16.mxu1 %vm1023_vm0, %v1022_v0 }
  0x69   :  { %850 = vmatmul.mubr.bf16.gmra.mrb[16].mxu0 %v917_v17  ;;  %874 = vmatmul.mubr.bf16.gmra.mrb[16].mxu1 %v921_v18 }
  0x6a   :  { %853 = vmatprep.mubr.msk.bf16.mxu0 %vm1023_vm0, %v1022_v0 }
  0x71   :  { %854 = vmatmul.mubr.bf16.gmra.mrb[20].mxu0 %v919_v19 }
 0x11c   :  { %v276_v21 = vpop.f32.mrb[0].mxu0  ;;  %v324_v22 = vpop.f32.mrb[0].mxu1 }
 0x11d   :  { %v435_v23 = vadd.f32 %v1118_v20, %v276_v21  ;;  %v835_v24 = vpop.f32.mrb[1].mxu0  ;;  %v447_v25 = vadd.f32 %v1118_v20, %v324_v22  ;;  %v859_v26 = vpop.f32.mrb[1].mxu1 }
 0x11e   :  { %v279_v27 = vpop.f32.mrb[2].mxu0  ;;  %v327_v28 = vpop.f32.mrb[2].mxu1 }
 0x11f   :  { %vm456_vm1 = vcmp.ge.f32.partialorder %v435_v23, 0.0  ;;  %v477_v29 = vmul.f32 0.2, %v435_v23  ;;  %v436_v30 = vadd.f32 %v1118_v20, %v279_v27  ;;  %v836_v31 = vpop.f32.mrb[3].mxu0  ;;  %vm468_vm2 = vcmp.ge.f32.partialorder %v447_v25, 0.0  ;;  %v860_v32 = vpop.f32.mrb[3].mxu1 }
 0x120   :  { %v489_v33 = vmul.f32 0.2, %v447_v25  ;;  %v448_v34 = vadd.f32 %v1118_v20, %v327_v28 }
 0x121   :  { %v498_v35 = vsel %vm456_vm1, %v435_v23, %v477_v29  ;;  %vm457_vm3 = vcmp.ge.f32.partialorder %v436_v30, 0.0  ;;  %v478_v36 = vmul.f32 0.2, %v436_v30 }
 0x122   :  { %519 = vst [vmem:[#allocation8] sm:$0xff] %v498_v35  ;;  %v1124_v37 = vsel %vm468_vm2, %v447_v25, %v489_v33  ;;  %vm469_vm4 = vcmp.ge.f32.partialorder %v448_v34, 0.0  ;;  %v490_v38 = vmul.f32 0.2, %v448_v34  ;;  %v695_v40 = vmul.f32 %v498_v35, %v498_v35 }
 0x123   :  { %v499_v39 = vsel %vm457_vm3, %v436_v30, %v478_v36  ;;  %531 = vst [vmem:[#allocation8 + $0x60] sm:$0xff] %v1124_v37 }
 0x124   :  { %520 = vst [vmem:[#allocation8 + $0x8] sm:$0xff] %v499_v39  ;;  %v669_v41 = vadd.f32 %v499_v39, %v498_v35  ;;  %v696_v42 = vmul.f32 %v499_v39, %v499_v39  ;;  %v284_v43 = vpop.f32.mrb[4].mxu0  ;;  %v1127_v44 = vsel %vm469_vm4, %v448_v34, %v490_v38  ;;  %v332_v45 = vpop.f32.mrb[4].mxu1 }
 0x125   :  { %v437_v46 = vadd.f32 %v1118_v20, %v284_v43  ;;  %v839_v47 = vpop.f32.mrb[5].mxu0  ;;  %532 = vst [vmem:[#allocation8 + $0x68] sm:$0xff] %v1127_v44  ;;  %v449_v48 = vadd.f32 %v1118_v20, %v332_v45  ;;  %v863_v49 = vpop.f32.mrb[5].mxu1 }
 0x126   :  { %v716_v50 = vadd.f32 %v696_v42, %v695_v40  ;;  %v287_v51 = vpop.f32.mrb[6].mxu0  ;;  %v335_v52 = vpop.f32.mrb[6].mxu1 }
 0x127   :  { %vm458_vm5 = vcmp.ge.f32.partialorder %v437_v46, 0.0  ;;  %v479_v53 = vmul.f32 0.2, %v437_v46  ;;  %v438_v54 = vadd.f32 %v1118_v20, %v287_v51  ;;  %v840_v55 = vpop.f32.mrb[7].mxu0  ;;  %vm470_vm6 = vcmp.ge.f32.partialorder %v449_v48, 0.0  ;;  %v864_v56 = vpop.f32.mrb[7].mxu1 }
 0x128   :  { %v491_v57 = vmul.f32 0.2, %v449_v48  ;;  %v450_v58 = vadd.f32 %v1118_v20, %v335_v52 }
 0x129   :  { %v500_v59 = vsel %vm458_vm5, %v437_v46, %v479_v53  ;;  %vm459_vm7 = vcmp.ge.f32.partialorder %v438_v54, 0.0  ;;  %v480_v60 = vmul.f32 0.2, %v438_v54 }
 0x12a   :  { %521 = vst [vmem:[#allocation8 + $0x10] sm:$0xff] %v500_v59  ;;  %v670_v61 = vadd.f32 %v669_v41, %v500_v59  ;;  %v697_v62 = vmul.f32 %v500_v59, %v500_v59  ;;  %v1134_v63 = vsel %vm470_vm6, %v449_v48, %v491_v57  ;;  %vm471_vm8 = vcmp.ge.f32.partialorder %v450_v58, 0.0 }
 0x12b   :  { %v501_v1 = vsel %vm459_vm7, %v438_v54, %v480_v60  ;;  %533 = vst [vmem:[#allocation8 + $0x70] sm:$0xff] %v1134_v63  ;;  %v492_v2 = vmul.f32 0.2, %v450_v58 }
 0x12c   :  { %v717_v3 = vadd.f32 %v716_v50, %v697_v62  ;;  %522 = vst [vmem:[#allocation8 + $0x18] sm:$0xff] %v501_v1  ;;  %v671_v4 = vadd.f32 %v670_v61, %v501_v1  ;;  %v698_v5 = vmul.f32 %v501_v1, %v501_v1  ;;  %v292_v6 = vpop.f32.mrb[8].mxu0  ;;  %v340_v7 = vpop.f32.mrb[8].mxu1 }
 0x12d   :  { %v439_v8 = vadd.f32 %v1118_v20, %v292_v6  ;;  %v843_v9 = vpop.f32.mrb[9].mxu0  ;;  %v1138_v10 = vsel %vm471_vm8, %v450_v58, %v492_v2  ;;  %v451_v11 = vadd.f32 %v1118_v20, %v340_v7  ;;  %v867_v12 = vpop.f32.mrb[9].mxu1 }
 0x12e   :  { %v718_v13 = vadd.f32 %v717_v3, %v698_v5  ;;  %v295_v14 = vpop.f32.mrb[10].mxu0  ;;  %534 = vst [vmem:[#allocation8 + $0x78] sm:$0xff] %v1138_v10  ;;  %v343_v15 = vpop.f32.mrb[10].mxu1 }
 0x12f   :  { %vm460_vm9 = vcmp.ge.f32.partialorder %v439_v8, 0.0  ;;  %v481_v16 = vmul.f32 0.2, %v439_v8  ;;  %v440_v17 = vadd.f32 %v1118_v20, %v295_v14  ;;  %v844_v18 = vpop.f32.mrb[11].mxu0  ;;  %vm472_vm10 = vcmp.ge.f32.partialorder %v451_v11, 0.0  ;;  %v868_v19 = vpop.f32.mrb[11].mxu1 }
 0x130   :  { %v493_v21 = vmul.f32 0.2, %v451_v11  ;;  %v452_v22 = vadd.f32 %v1118_v20, %v343_v15 }
 0x131   :  { %v502_v23 = vsel %vm460_vm9, %v439_v8, %v481_v16  ;;  %vm461_vm11 = vcmp.ge.f32.partialorder %v440_v17, 0.0  ;;  %v482_v24 = vmul.f32 0.2, %v440_v17 }
 0x132   :  { %523 = vst [vmem:[#allocation8 + $0x20] sm:$0xff] %v502_v23  ;;  %v672_v25 = vadd.f32 %v671_v4, %v502_v23  ;;  %v699_v26 = vmul.f32 %v502_v23, %v502_v23  ;;  %v1144_v27 = vsel %vm472_vm10, %v451_v11, %v493_v21  ;;  %vm473_vm12 = vcmp.ge.f32.partialorder %v452_v22, 0.0 }
 0x133   :  { %v503_v28 = vsel %vm461_vm11, %v440_v17, %v482_v24  ;;  %535 = vst [vmem:[#allocation8 + $0x80] sm:$0xff] %v1144_v27  ;;  %v494_v29 = vmul.f32 0.2, %v452_v22 }
 0x134   :  { %v719_v30 = vadd.f32 %v718_v13, %v699_v26  ;;  %524 = vst [vmem:[#allocation8 + $0x28] sm:$0xff] %v503_v28  ;;  %v673_v31 = vadd.f32 %v672_v25, %v503_v28  ;;  %v700_v32 = vmul.f32 %v503_v28, %v503_v28  ;;  %v300_v33 = vpop.f32.mrb[12].mxu0  ;;  %v348_v34 = vpop.f32.mrb[12].mxu1 }
 0x135   :  { %v441_v35 = vadd.f32 %v1118_v20, %v300_v33  ;;  %v847_v36 = vpop.f32.mrb[13].mxu0  ;;  %v1148_v38 = vsel %vm473_vm12, %v452_v22, %v494_v29  ;;  %v453_v39 = vadd.f32 %v1118_v20, %v348_v34  ;;  %v871_v40 = vpop.f32.mrb[13].mxu1  ;;  %v540_v34 = vlaneseq }
 0x136   :  { %v720_v41 = vadd.f32 %v719_v30, %v700_v32  ;;  %v303_v42 = vpop.f32.mrb[14].mxu0  ;;  %536 = vst [vmem:[#allocation8 + $0x88] sm:$0xff] %v1148_v38  ;;  %v351_v43 = vpop.f32.mrb[14].mxu1 }
 0x137   :  { %vm462_vm13 = vcmp.ge.f32.partialorder %v441_v35, 0.0  ;;  %v483_v45 = vmul.f32 0.2, %v441_v35  ;;  %v442_v46 = vadd.f32 %v1118_v20, %v303_v42  ;;  %v848_v47 = vpop.f32.mrb[15].mxu0  ;;  %vm474_vm14 = vcmp.ge.f32.partialorder %v453_v39, 0.0  ;;  %v872_v48 = vpop.f32.mrb[15].mxu1 }
 0x138   :  { %v495_v49 = vmul.f32 0.2, %v453_v39  ;;  %v454_v50 = vadd.f32 %v1118_v20, %v351_v43 }
 0x139   :  { %v504_v51 = vsel %vm462_vm13, %v441_v35, %v483_v45  ;;  %vm463_vm15 = vcmp.ge.f32.partialorder %v442_v46, 0.0  ;;  %v484_v52 = vmul.f32 0.2, %v442_v46 }
 0x13a   :  { %525 = vst [vmem:[#allocation8 + $0x30] sm:$0xff] %v504_v51  ;;  %v674_v53 = vadd.f32 %v673_v31, %v504_v51  ;;  %v701_v54 = vmul.f32 %v504_v51, %v504_v51  ;;  %v1154_v55 = vsel %vm474_vm14, %v453_v39, %v495_v49  ;;  %vm475_vm0 = vcmp.ge.f32.partialorder %v454_v50, 0.0 }
 0x13b   :  { %v505_v56 = vsel %vm463_vm15, %v442_v46, %v484_v52  ;;  %537 = vst [vmem:[#allocation8 + $0x90] sm:$0xff] %v1154_v55  ;;  %v496_v57 = vmul.f32 0.2, %v454_v50  ;;  %v541_v46 = vshrl.u32 %v540_v34, 7 }
 0x13c   :  { %v721_v58 = vadd.f32 %v720_v41, %v701_v54  ;;  %526 = vst [vmem:[#allocation8 + $0x38] sm:$0xff] %v505_v56  ;;  %v675_v59 = vadd.f32 %v674_v53, %v505_v56  ;;  %v702_v60 = vmul.f32 %v505_v56, %v505_v56  ;;  %v308_v61 = vpop.f32.mrb[16].mxu0  ;;  %v356_v62 = vpop.f32.mrb[16].mxu1 }
 0x13d   :  { %v443_v1 = vadd.f32 %v1118_v20, %v308_v61  ;;  %v851_v2 = vpop.f32.mrb[17].mxu0  ;;  %v1158_v3 = vsel %vm475_vm0, %v454_v50, %v496_v57  ;;  %v455_v4 = vadd.f32 %v1118_v20, %v356_v62  ;;  %v875_v5 = vpop.f32.mrb[17].mxu1 }
 0x13e   :  { %v722_v6 = vadd.f32 %v721_v58, %v702_v60  ;;  %v311_v7 = vpop.f32.mrb[18].mxu0  ;;  %538 = vst [vmem:[#allocation8 + $0x98] sm:$0xff] %v1158_v3  ;;  %v359_v8 = vpop.f32.mrb[18].mxu1 }
 0x13f   :  { %vm464_vm1 = vcmp.ge.f32.partialorder %v443_v1, 0.0  ;;  %v485_v9 = vmul.f32 0.2, %v443_v1  ;;  %v444_v11 = vadd.f32 %v1118_v20, %v311_v7  ;;  %v852_v12 = vpop.f32.mrb[19].mxu0  ;;  %vm476_vm2 = vcmp.ge.f32.partialorder %v455_v4, 0.0  ;;  %v876_v13 = vpop.f32.mrb[19].mxu1 }
 0x140   :  { %v497_v14 = vmul.f32 0.2, %v455_v4 }
 0x141   :  { %v506_v15 = vsel %vm464_vm1, %v443_v1, %v485_v9  ;;  %vm465_vm3 = vcmp.ge.f32.partialorder %v444_v11, 0.0  ;;  %v486_v16 = vmul.f32 0.2, %v444_v11 }
 0x142   :  { %527 = vst [vmem:[#allocation8 + $0x40] sm:$0xff] %v506_v15  ;;  %v676_v17 = vadd.f32 %v675_v59, %v506_v15  ;;  %v703_v18 = vmul.f32 %v506_v15, %v506_v15  ;;  %v1163_v19 = vsel %vm476_vm2, %v455_v4, %v497_v14 }
 0x143   :  { %v507_v21 = vsel %vm465_vm3, %v444_v11, %v486_v16  ;;  %539 = vst [vmem:[#allocation8 + $0xa0] sm:$0xff] %v1163_v19 }
 0x144   :  { %v723_v22 = vadd.f32 %v722_v6, %v703_v18  ;;  %528 = vst [vmem:[#allocation8 + $0x48] sm:$0xff] %v507_v21  ;;  %v677_v23 = vadd.f32 %v676_v17, %v507_v21  ;;  %v704_v24 = vmul.f32 %v507_v21, %v507_v21  ;;  %v316_v25 = vpop.f32.mrb[20].mxu0 }
 0x145   :  { %v445_v26 = vadd.f32 %v1118_v20, %v316_v25  ;;  %v855_v28 = vpop.f32.mrb[21].mxu0 }
 0x146   :  { %v724_v29 = vadd.f32 %v723_v22, %v704_v24  ;;  %v319_v30 = vpop.f32.mrb[22].mxu0 }
 0x147   :  { %vm466_vm4 = vcmp.ge.f32.partialorder %v445_v26, 0.0  ;;  %v487_v31 = vmul.f32 0.2, %v445_v26  ;;  %v446_v32 = vadd.f32 %v1118_v20, %v319_v30  ;;  %v856_v33 = vpop.f32.mrb[23].mxu0 }
 0x149   :  { %v508_v35 = vsel %vm466_vm4, %v445_v26, %v487_v31  ;;  %vm467_vm5 = vcmp.ge.f32.partialorder %v446_v32, 0.0  ;;  %v488_v36 = vmul.f32 0.2, %v446_v32 }
 0x14a   :  { %529 = vst [vmem:[#allocation8 + $0x50] sm:$0xff] %v508_v35  ;;  %v678_v39 = vadd.f32 %v677_v23, %v508_v35  ;;  %v705_v40 = vmul.f32 %v508_v35, %v508_v35 }
 0x14b   :  { %v509_v41 = vsel %vm467_vm5, %v446_v32, %v488_v36 }
 0x14c   :  { %v725_v42 = vadd.f32 %v724_v29, %v705_v40  ;;  %530 = vst [vmem:[#allocation8 + $0x58] sm:$0xff] %v509_v41  ;;  %v679_v43 = vadd.f32 %v678_v39, %v509_v41  ;;  %v706_v45 = vmul.f32 %v509_v41, %v509_v41 }
 0x14d   :  { %977 = shalt.err (!%p974_p6)
}
 0x14e   :  { %s978_s19 = scalar_lea.hbm %s1221_s3, 2688 }
 0x14f   :  { %p979_p7 = scmp.ne.s32.totalorder %s1221_s3, %s978_s19  ;;  %p982_p8 = scmp.lt.u32.totalorder %s978_s19, %s1221_s3 }
 0x151   :  { %p984_p9 = pnand %p982_p8, %p979_p7 }
 0x153   :  { %987 = shalt.err (!%p984_p9)
}
 0x154   :  { %s1025_s24 = smov 128   ;;  %s1026_s25 = smov 8   ;;  %v707_v20 = vmul.f32 %v1124_v37, %v1124_v37  ;;  %v680_v47 = vadd.f32 %v679_v43, %v1124_v37  ;;  %v726_v48 = vadd.f32 %v725_v42, %v706_v45  ;;  %v708_v49 = vmul.f32 %v1127_v44, %v1127_v44 }
 0x155   :  { %756 = dma.vmem_to_hbm [thread:$0]  %s751_s15, 2688, %s1221_s3, [#allocation5], %s1025_s24, %s1025_s24, %s1026_s25   ;;  %v561_v52 = vadd.s32 160, %v541_v46  ;;  %v709_v53 = vmul.f32 %v1134_v63, %v1134_v63  ;;  %v710_v57 = vmul.f32 %v1138_v10, %v1138_v10  ;;  %v711_v59 = vmul.f32 %v1144_v27, %v1144_v27 }
 0x156   :  { %v681_v50 = vadd.f32 %v680_v47, %v1127_v44  ;;  %v727_v51 = vadd.f32 %v726_v48, %v707_v20  ;;  %v712_v62 = vmul.f32 %v1148_v38, %v1148_v38  ;;  %s1027_s3 = smov [#allocation9]   ;;  %vm742_vm7 = vcmask 1040384  }
 0x157   :  { %vm605_vm6 = vcmp.lt.s32.totalorder %v561_v52, 162  ;;  %s763_s28 = sshll.u32 %s1027_s3, 4  ;;  %s764_s28 = int_to_ptr.vmem [resolvable:$true] %s763_s28 }
 0x158   :  { %v682_v54 = vadd.f32 %v681_v50, %v1134_v63  ;;  %v728_v56 = vadd.f32 %v727_v51, %v708_v49  ;;  %v797_v61 = vsel %vm605_vm6, 1.0, %v1022_v0  ;;  %v714_v0 = vmul.f32 %v1158_v3, %v1158_v3  ;;  %s988_s29 = scalar_lea.vmem %s764_s28, 32  ;;  %p993_p11 = scmp.lt.s32.totalorder %s764_s28, %s764_s28 }
 0x159   :  { %v668_v5 = vmul.f32 %v797_v61, %v1163_v19  ;;  %p989_p10 = scmp.ne.s32.totalorder %s764_s28, %s988_s29  ;;  %p994_p12 = scmp.lt.s32.totalorder %s988_s29, %s988_s29 }
 0x15a   :  { %v729_v58 = vadd.f32 %v728_v56, %v709_v53  ;;  %v683_v37 = vadd.f32 %v682_v54, %v1138_v10  ;;  %v713_v10 = vmul.f32 %v1154_v55, %v1154_v55 }
 0x15b   :  { %v715_v9 = vmul.f32 %v668_v5, %v668_v5  ;;  %p995_p13 = por %p994_p12, %p993_p11 }
 0x15c   :  { %v684_v44 = vadd.f32 %v683_v37, %v1144_v27  ;;  %v730_v60 = vadd.f32 %v729_v58, %v710_v57 }
 0x15d   :  { %p996_p0 = pnand %p995_p13, %p989_p10 }
 0x15e   :  { %v685_v63 = vadd.f32 %v684_v44, %v1148_v38  ;;  %v731_v1 = vadd.f32 %v730_v60, %v711_v59 }
 0x160   :  { %v686_v2 = vadd.f32 %v685_v63, %v1154_v55  ;;  %v732_v4 = vadd.f32 %v731_v1, %v712_v62 }
 0x162   :  { %v733_v6 = vadd.f32 %v732_v4, %v713_v10  ;;  %v687_v27 = vadd.f32 %v686_v2, %v1158_v3 }
 0x164   :  { %v734_v7 = vadd.f32 %v733_v6, %v714_v0  ;;  %v688_v8 = vadd.f32 %v687_v27, %v668_v5 }
 0x166   :  { %v689_v11 = vrot.slane %v688_v8, 4  ;;  %v735_v38 = vadd.f32 %v734_v7, %v715_v9 }
 0x168   :  { %v690_v12 = vadd.f32 %v689_v11, %v688_v8  ;;  %v736_v13 = vrot.slane %v735_v38, 4 }
 0x16a   :  { %v691_v14 = vrot.slane %v690_v12, 2  ;;  %v737_v15 = vadd.f32 %v736_v13, %v735_v38 }
 0x16c   :  { %v692_v16 = vadd.f32 %v691_v14, %v690_v12  ;;  %v738_v55 = vrot.slane %v737_v15, 2 }
 0x16e   :  { %v693_v17 = vrot.slane %v692_v16, 1  ;;  %v739_v18 = vadd.f32 %v738_v55, %v737_v15 }
 0x170   :  { %v740_v19 = vrot.slane %v739_v18, 1  ;;  %v694_v21 = vadd.f32 %v693_v17, %v692_v16 }
 0x172   :  { %v741_v22 = vadd.f32 %v740_v19, %v739_v18 }
 0x174   :  { %v743_v3 = vsel %vm742_vm7, %v694_v21, %v741_v22 }
 0x175   :  { %744 = vst [vmem:[#allocation9] sm:$0x3] %v743_v3 }
 0x176   :  { %999 = shalt.err (!%p996_p0)
}
 0x177   :  { %s1000_s6 = scalar_lea.hbm %s1222_s4, 32 }
 0x178   :  { %p1001_p1 = scmp.ne.s32.totalorder %s1222_s4, %s1000_s6  ;;  %p1004_p2 = scmp.lt.u32.totalorder %s1000_s6, %s1222_s4 }
 0x17a   :  { %p1006_p3 = pnand %p1004_p2, %p1001_p1 }
 0x17c   :  { %1009 = shalt.err (!%p1006_p3)
}
 0x17d   :  { %766 = dma.vmem_to_hbm [thread:$0]  %s764_s28, 32, %s1222_s4, [#allocation10]  }
 0x17e   :  { %1014 = dma.done.wait [#allocation5], 2688  }
 0x17f   :  { %1015 = vsyncadd [#allocation5], 4294964608 }
 0x180   :  { %1016 = dma.done.wait [#allocation10], 32  }
 0x181   :  { %1017 = vsyncadd [#allocation10], 4294967264 }
 0x182   :  { %773 = vsyncpa [#allocation4], 1 }
 0x183   :  { %774 = vsyncpa [#allocation7], 1 }
 0x184   :  { %775 = vsyncpa [#allocation5], 1 }
 0x185   :  { %776 = vsyncpa [#allocation10], 1 }

</bundles_post_ra>
